<compile_context>
chip_gen: v7x
topology: tpu7x:2x2x1
jax: 0.10.0
libtpu: 0.0.40
codegen_flags: <defaults>
</compile_context>

<pallas_src>
import functools
import math

import jax
import jax.numpy as jnp
from jax import lax
from jax.experimental import pallas as pl
from jax.experimental.pallas import tpu as pltpu


def _round_up(a: int, b: int) -> int:
    return ((a + b - 1) // b) * b


def swiglu_kernel(x_ref, w1_ref, w3_ref, w2_ref, o_ref, acc_ref, *, compute_dtype):
    n = pl.program_id(1)

    # NT contraction: contract the last dim of both operands (x @ w.T) so the
    # weights can stay in their native PyTorch layout (no wrapper transpose).
    dn = (((1,), (1,)), ((), ()))

    x = x_ref[...].astype(compute_dtype)                 # (tm, d_model)
    w1 = w1_ref[...].astype(compute_dtype)               # (tn, d_model)
    w3 = w3_ref[...].astype(compute_dtype)               # (tn, d_model)

    a = lax.dot_general(x, w1, dimension_numbers=dn,
                        preferred_element_type=jnp.float32)      # (tm, tn) f32
    b = lax.dot_general(x, w3, dimension_numbers=dn,
                        preferred_element_type=jnp.float32)      # (tm, tn) f32

    # silu + gating in f32 (sigmoid goes to the EUP slot, free under the MXU),
    # then back to the MXU-native dtype for the down-projection.
    gated = (a * jax.nn.sigmoid(a) * b).astype(compute_dtype)    # (tm, tn)

    w2 = w2_ref[...].astype(compute_dtype)               # (d_model, tn)
    partial = lax.dot_general(gated, w2, dimension_numbers=dn,
                              preferred_element_type=jnp.float32)  # (tm, d_model)

    @pl.when(n == 0)
    def _():                                             # first chunk: no zero-fill+add
        acc_ref[...] = partial

    @pl.when(n > 0)
    def _():
        acc_ref[...] += partial

    @pl.when(n == pl.num_programs(1) - 1)
    def _():
        o_ref[...] = acc_ref[...].astype(o_ref.dtype)


def swiglu_pallas(x, w1, w2, w3, *, tm=None, tn=None,
                  compute_dtype=jnp.bfloat16, vmem_limit_bytes=None):
    """SwiGLU forward.

    x: (..., d_model); w1, w3: (d_ff, d_model); w2: (d_model, d_ff).
    Matmuls run in `compute_dtype` (bf16 by default) with f32 accumulation;
    results match a pure-f32 reference to within bf16 rounding.
    """
    orig_shape = x.shape
    d_model = orig_shape[-1]
    d_ff = w1.shape[0]

    x2d = x.reshape(-1, d_model)
    M = x2d.shape[0]
    MiB = 1024 * 1024

    # --- generation-aware tile sizes & VMEM budget ---------------------------
    try:
        vmem_cap = int(pltpu.get_tpu_info().vmem_capacity_bytes)
    except Exception:
        vmem_cap = 64 * MiB                       # conservative (v7x-sized) fallback

    if vmem_limit_bytes is None:
        # Leave headroom below physical VMEM for compiler-internal scratch:
        # ~54 MiB on a 64 MiB v7x core, ~108 MiB on 128 MiB v5e/v6e cores.
        vmem_limit_bytes = min(int(vmem_cap * 0.85), 112 * MiB)
    budget = int(vmem_limit_bytes * 0.8)

    small_vmem = vmem_cap <= 72 * MiB             # v7x-class part
    if tm is None:
        tm = 512 if small_vmem else 1024          # weight-byte intensity target
    if tn is None:
        tn = 512 if small_vmem else 1024          # fewer acc RMW sweeps / grid steps

    x_b = jnp.dtype(x.dtype).itemsize
    w_b = jnp.dtype(w1.dtype).itemsize
    o_b = x_b

    def vmem_est(tm_, tn_):
        blk = 2 * (tm_ * d_model * x_b            # x block   (double-buffered)
                   + 3 * tn_ * d_model * w_b      # w1/w3/w2 chunks (double-buffered)
                   + tm_ * d_model * o_b)         # out block (double-buffered)
        acc = tm_ * d_model * 4                   # f32 accumulator scratch
        inter = 3 * tm_ * tn_ * 4                 # a / b / gated f32 intermediates
        return blk + acc + inter

    tm_eff = min(_round_up(tm, 8), _round_up(M, 8))
    tn_eff = min(_round_up(tn, 128), _round_up(d_ff, 128))
    while vmem_est(tm_eff, tn_eff) > budget and tm_eff > 256:
        tm_eff = max(_round_up(tm_eff // 2, 8), 256)
    while vmem_est(tm_eff, tn_eff) > budget and tn_eff > 128:
        tn_eff = max(_round_up(tn_eff // 2, 128), 128)

    # d_ff must be a multiple of tn_eff; zero padding is exact (silu(0)*0 @ 0 == 0).
    # Production callers should cache pre-padded weights to avoid this HBM copy.
    d_ff_pad = _round_up(d_ff, tn_eff)
    if d_ff_pad != d_ff:
        w1 = jnp.pad(w1, ((0, d_ff_pad - d_ff), (0, 0)))
        w3 = jnp.pad(w3, ((0, d_ff_pad - d_ff), (0, 0)))
        w2 = jnp.pad(w2, ((0, 0), (0, d_ff_pad - d_ff)))

    grid = (pl.cdiv(M, tm_eff), d_ff_pad // tn_eff)

    kernel = functools.partial(swiglu_kernel, compute_dtype=compute_dtype)

    out2d = pl.pallas_call(
        kernel,
        out_shape=jax.ShapeDtypeStruct((M, d_model), x.dtype),
        grid_spec=pltpu.PrefetchScalarGridSpec(
            num_scalar_prefetch=0,
            grid=grid,
            in_specs=[
                pl.BlockSpec((tm_eff, d_model), lambda i, n: (i, 0)),   # x rows
                pl.BlockSpec((tn_eff, d_model), lambda i, n: (n, 0)),   # w1 chunk (native)
                pl.BlockSpec((tn_eff, d_model), lambda i, n: (n, 0)),   # w3 chunk (native)
                pl.BlockSpec((d_model, tn_eff), lambda i, n: (0, n)),   # w2 chunk (native)
            ],
            out_specs=pl.BlockSpec((tm_eff, d_model), lambda i, n: (i, 0)),
            scratch_shapes=[pltpu.VMEM((tm_eff, d_model), jnp.float32)],
        ),
        compiler_params=pltpu.CompilerParams(
            dimension_semantics=("parallel", "arbitrary"),
            vmem_limit_bytes=vmem_limit_bytes,
        ),
    )(x2d, w1, w3, w2)

    return out2d.reshape(orig_shape)


def xavier_uniform(key, out_features, in_features):
    bound = math.sqrt(6.0 / (in_features + out_features))
    return jax.random.uniform(
        key, (out_features, in_features), dtype=jnp.float32,
        minval=-bound, maxval=bound)


def swiglu_ref(x, w1, w2, w3):
    x32 = x.astype(jnp.float32)
    a = x32 @ w1.T
    b = x32 @ w3.T
    gated = jax.nn.silu(a) * b
    return (gated @ w2.T).astype(x.dtype)


if __name__ == "__main__":
    # Small shapes: batch=2, seq=8, d_model=32 -> d_ff = ceil(8*32/3 / 64)*64 = 128
    batch, seq, d_model = 2, 8, 32
    d_ff = math.ceil((8 * d_model / 3) / 64) * 64     # 128

    key = jax.random.PRNGKey(0)
    kx, k1, k2, k3 = jax.random.split(key, 4)

    x = jax.random.normal(kx, (batch, seq, d_model), dtype=jnp.float32).astype(jnp.bfloat16)
    w1 = xavier_uniform(k1, d_ff, d_model)            # (d_ff, d_model)
    w2 = xavier_uniform(k2, d_model, d_ff)            # (d_model, d_ff)
    w3 = xavier_uniform(k3, d_ff, d_model)            # (d_ff, d_model)

    swiglu_jit = jax.jit(swiglu_pallas)
    out = jax.block_until_ready(swiglu_jit(x, w1, w2, w3))

    ref = jax.block_until_ready(swiglu_ref(x, w1, w2, w3))
    assert out.shape == ref.shape and out.dtype == ref.dtype
    assert jnp.allclose(out.astype(jnp.float32), ref.astype(jnp.float32),
                        atol=5e-2, rtol=5e-2)

    print("KERNEL_OK")
</pallas_src>

<mosaic_0001>
module attributes {stable_mosaic.version = 11 : i64} {
  func.func @swiglu_kernel(%arg0: i32, %arg1: i32, %arg2: memref<16x32xbf16, #tpu.memory_space<vmem>>, %arg3: memref<128x32xf32, #tpu.memory_space<vmem>>, %arg4: memref<128x32xf32, #tpu.memory_space<vmem>>, %arg5: memref<32x128xf32, #tpu.memory_space<vmem>>, %arg6: memref<16x32xbf16, #tpu.memory_space<vmem>>, %arg7: memref<16x32xf32, #tpu.memory_space<vmem>>) attributes {dimension_semantics = [#tpu.dimension_semantics<parallel>, #tpu.dimension_semantics<arbitrary>], iteration_bounds = array<i64: 1, 1>, scalar_prefetch = 0 : i64, scratch_operands = 1 : i64, tpu.core_type = #tpu.core_type<tc>, window_params = [{transform_indices = @transform_0, window_bounds = array<i64: 16, 32>}, {transform_indices = @transform_1, window_bounds = array<i64: 128, 32>}, {transform_indices = @transform_2, window_bounds = array<i64: 128, 32>}, {transform_indices = @transform_3, window_bounds = array<i64: 32, 128>}, {transform_indices = @transform_4, window_bounds = array<i64: 16, 32>}]} {
    %c0 = arith.constant 0 : index
    %c0_0 = arith.constant 0 : index
    %0 = vector.load %arg2[%c0, %c0_0] : memref<16x32xbf16, #tpu.memory_space<vmem>>, vector<16x32xbf16>
    %c0_1 = arith.constant 0 : index
    %c0_2 = arith.constant 0 : index
    %1 = vector.load %arg3[%c0_1, %c0_2] : memref<128x32xf32, #tpu.memory_space<vmem>>, vector<128x32xf32>
    %2 = arith.truncf %1 : vector<128x32xf32> to vector<128x32xbf16>
    %c0_3 = arith.constant 0 : index
    %c0_4 = arith.constant 0 : index
    %3 = vector.load %arg4[%c0_3, %c0_4] : memref<128x32xf32, #tpu.memory_space<vmem>>, vector<128x32xf32>
    %4 = arith.truncf %3 : vector<128x32xf32> to vector<128x32xbf16>
    %cst = arith.constant dense<0.000000e+00> : vector<16x128xf32>
    %5 = tpu.matmul %0, %2, %cst {dimension_numbers = #tpu.dot_dimension_numbers<[1], [1], [0], [0], [0, 0, 1, 0], [], []>} : vector<16x32xbf16>, vector<128x32xbf16>, vector<16x128xf32> -> vector<16x128xf32>
    %cst_5 = arith.constant dense<0.000000e+00> : vector<16x128xf32>
    %6 = tpu.matmul %0, %4, %cst_5 {dimension_numbers = #tpu.dot_dimension_numbers<[1], [1], [0], [0], [0, 0, 1, 0], [], []>} : vector<16x32xbf16>, vector<128x32xbf16>, vector<16x128xf32> -> vector<16x128xf32>
    %7 = arith.negf %5 : vector<16x128xf32>
    %8 = math.exp %7 : vector<16x128xf32>
    %cst_6 = arith.constant 1.000000e+00 : f32
    %9 = vector.broadcast %cst_6 : f32 to vector<16x128xf32>
    %10 = arith.addf %9, %8 : vector<16x128xf32>
    %11 = arith.divf %9, %10 : vector<16x128xf32>
    %12 = arith.mulf %5, %11 : vector<16x128xf32>
    %13 = arith.mulf %12, %6 : vector<16x128xf32>
    %14 = arith.truncf %13 : vector<16x128xf32> to vector<16x128xbf16>
    %c0_7 = arith.constant 0 : index
    %c0_8 = arith.constant 0 : index
    %15 = vector.load %arg5[%c0_7, %c0_8] : memref<32x128xf32, #tpu.memory_space<vmem>>, vector<32x128xf32>
    %16 = arith.truncf %15 : vector<32x128xf32> to vector<32x128xbf16>
    %cst_9 = arith.constant dense<0.000000e+00> : vector<16x32xf32>
    %17 = tpu.matmul %14, %16, %cst_9 {dimension_numbers = #tpu.dot_dimension_numbers<[1], [1], [0], [0], [0, 0, 1, 0], [], []>} : vector<16x128xbf16>, vector<32x128xbf16>, vector<16x32xf32> -> vector<16x32xf32>
    %c0_i32 = arith.constant 0 : i32
    %18 = arith.cmpi eq, %arg1, %c0_i32 : i32
    %19 = arith.extui %18 : i1 to i32
    %c0_i32_10 = arith.constant 0 : i32
    %20 = arith.cmpi ne, %19, %c0_i32_10 : i32
    scf.if %20 {
      %c0_15 = arith.constant 0 : index
      %c0_16 = arith.constant 0 : index
      %27 = vector.load %arg7[%c0_15, %c0_16] : memref<16x32xf32, #tpu.memory_space<vmem>>, vector<16x32xf32>
      tpu.vector_store %arg7[%c0_15, %c0_16], %17 {strides = array<i32>} : memref<16x32xf32, #tpu.memory_space<vmem>>, vector<16x32xf32>,
    } else {
    }
    %c0_i32_11 = arith.constant 0 : i32
    %21 = arith.cmpi sgt, %arg1, %c0_i32_11 : i32
    %22 = arith.extui %21 : i1 to i32
    %c0_i32_12 = arith.constant 0 : i32
    %23 = arith.cmpi ne, %22, %c0_i32_12 : i32
    scf.if %23 {
      %c0_15 = arith.constant 0 : index
      %c0_16 = arith.constant 0 : index
      %27 = vector.load %arg7[%c0_15, %c0_16] : memref<16x32xf32, #tpu.memory_space<vmem>>, vector<16x32xf32>
      %28 = arith.addf %27, %17 : vector<16x32xf32>
      %c0_17 = arith.constant 0 : index
      %c0_18 = arith.constant 0 : index
      %29 = vector.load %arg7[%c0_17, %c0_18] : memref<16x32xf32, #tpu.memory_space<vmem>>, vector<16x32xf32>
      tpu.vector_store %arg7[%c0_17, %c0_18], %28 {strides = array<i32>} : memref<16x32xf32, #tpu.memory_space<vmem>>, vector<16x32xf32>,
    } else {
    }
    %c0_i32_13 = arith.constant 0 : i32
    %24 = arith.cmpi eq, %arg1, %c0_i32_13 : i32
    %25 = arith.extui %24 : i1 to i32
    %c0_i32_14 = arith.constant 0 : i32
    %26 = arith.cmpi ne, %25, %c0_i32_14 : i32
    scf.if %26 {
      %c0_15 = arith.constant 0 : index
      %c0_16 = arith.constant 0 : index
      %27 = vector.load %arg7[%c0_15, %c0_16] : memref<16x32xf32, #tpu.memory_space<vmem>>, vector<16x32xf32>
      %28 = arith.truncf %27 : vector<16x32xf32> to vector<16x32xbf16>
      %c0_17 = arith.constant 0 : index
      %c0_18 = arith.constant 0 : index
      %29 = vector.load %arg6[%c0_17, %c0_18] : memref<16x32xbf16, #tpu.memory_space<vmem>>, vector<16x32xbf16>
      tpu.vector_store %arg6[%c0_17, %c0_18], %28 {strides = array<i32>} : memref<16x32xbf16, #tpu.memory_space<vmem>>, vector<16x32xbf16>,
    } else {
    }
    return
  }
  func.func @transform_0(%arg0: i32, %arg1: i32) -> (i32, i32) {
    %c0_i32 = arith.constant 0 : i32
    %c0_i32_0 = arith.constant 0 : i32
    return %arg0, %c0_i32 : i32, i32
  }
  func.func @transform_1(%arg0: i32, %arg1: i32) -> (i32, i32) {
    %c0_i32 = arith.constant 0 : i32
    %c0_i32_0 = arith.constant 0 : i32
    return %arg1, %c0_i32 : i32, i32
  }
  func.func @transform_2(%arg0: i32, %arg1: i32) -> (i32, i32) {
    %c0_i32 = arith.constant 0 : i32
    %c0_i32_0 = arith.constant 0 : i32
    return %arg1, %c0_i32 : i32, i32
  }
  func.func @transform_3(%arg0: i32, %arg1: i32) -> (i32, i32) {
    %c0_i32 = arith.constant 0 : i32
    %c0_i32_0 = arith.constant 0 : i32
    return %c0_i32, %arg1 : i32, i32
  }
  func.func @transform_4(%arg0: i32, %arg1: i32) -> (i32, i32) {
    %c0_i32 = arith.constant 0 : i32
    %c0_i32_0 = arith.constant 0 : i32
    return %arg0, %c0_i32 : i32, i32
  }
}

</mosaic_0001>

<bundles_post_ra>
// kernel: swiglu_pallas.1
= control target key start
LH: loop header
LB: loop body
LE: loop exit
PB: predicated region body
PF: predicated region fallthrough
CT: control target
= control target key end

     0   :  { %vm74_vm0 = vcmask 261120   ;;  %v436_v2 = vmov 0.0   ;;  %vm437_vm1 = vmmov 0   ;;  %s633_s0 = inlined_call_operand.vmem [shape: bf16[16,32], index: 0, kind: input, shape index: {}]   ;;  %s634_s1 = inlined_call_operand.vmem [shape: f32[128,32], index: 1, kind: input, shape index: {}]   ;;  %s635_s2 = inlined_call_operand.vmem [shape: f32[128,32], index: 2, kind: input, shape index: {}]   ;;  %s636_s3 = inlined_call_operand.vmem [shape: f32[32,128], index: 3, kind: input, shape index: {}]   ;;  %s637_s4 = inlined_call_operand.hbm [shape: bf16[16,32], index: 4, kind: output, shape index: {}]  }
   0x1   :  { %v21_v0 = vld [vmem:[%s634_s1] sm:$0xff]  ;;  %v22_v1 = vld [vmem:[%s634_s1 + $0x8] sm:$0xff]  ;;  %350 = vmatprep.subr.bf16.mxu0 %v436_v2  ;;  %370 = vmatprep.subr.bf16.mxu1 %v436_v2  ;;  %v23_v4 = vld [vmem:[%s634_s1 + $0x10] sm:$0xff] }
   0x2   :  { %v37_v3 = vpack.c.bf16 %v22_v1, %v21_v0  ;;  %v24_v5 = vld [vmem:[%s634_s1 + $0x18] sm:$0xff]  ;;  %v45_v6 = vld [vmem:[%s635_s2] sm:$0xff]  ;;  %366 = vmatprep.mubr.msk.bf16.mxu0 %vm437_vm1, %v436_v2  ;;  %386 = vmatprep.mubr.msk.bf16.mxu1 %vm437_vm1, %v436_v2  ;;  %v46_v8 = vld [vmem:[%s635_s2 + $0x8] sm:$0xff] }
   0x3   :  { %v61_v9 = vpack.c.bf16 %v46_v8, %v45_v6  ;;  %v38_v10 = vpack.c.bf16 %v24_v5, %v23_v4  ;;  %v47_v11 = vld [vmem:[%s635_s2 + $0x10] sm:$0xff]  ;;  %v48_v12 = vld [vmem:[%s635_s2 + $0x18] sm:$0xff]  ;;  %v25_v16 = vld [vmem:[%s634_s1 + $0x20] sm:$0xff] }
   0x4   :  { %v79_v7 = vsel %vm74_vm0, %v37_v3, 0  ;;  %v62_v14 = vpack.c.bf16 %v48_v12, %v47_v11  ;;  %v26_v17 = vld [vmem:[%s634_s1 + $0x28] sm:$0xff] }
   0x5   :  { %351 = vmatpush3.bf16.xpose.msra.mxu0 %v79_v7  ;;  %v144_v13 = vsel %vm74_vm0, %v61_v9, 0  ;;  %v82_v15 = vsel %vm74_vm0, %v38_v10, 0 }
   0x6   :  { %352 = vmatprep.subr.bf16.mxu0 %v436_v2  ;;  %371 = vmatpush3.bf16.xpose.msra.mxu1 %v144_v13 }
   0x7   :  { %372 = vmatprep.subr.bf16.mxu1 %v436_v2 }
   0x8   :  { %9 = vsyncpa [#allocation4], 0  ;;  %v147_v18 = vsel %vm74_vm0, %v62_v14, 0  ;;  %v39_v19 = vpack.c.bf16 %v26_v17, %v25_v16  ;;  %v49_v20 = vld [vmem:[%s635_s2 + $0x20] sm:$0xff]  ;;  %v50_v21 = vld [vmem:[%s635_s2 + $0x28] sm:$0xff]  ;;  %vm301_vm2 = vcmask 257024  }
   0x9   :  { %v63_v22 = vpack.c.bf16 %v50_v21, %v49_v20  ;;  %v27_v24 = vld [vmem:[%s634_s1 + $0x30] sm:$0xff]  ;;  %v28_v25 = vld [vmem:[%s634_s1 + $0x38] sm:$0xff]  ;;  %v29_v32 = vld [vmem:[%s634_s1 + $0x40] sm:$0xff] }
   0xa   :  { %v85_v23 = vsel %vm74_vm0, %v39_v19, 0  ;;  %v40_v27 = vpack.c.bf16 %v28_v25, %v27_v24  ;;  %v51_v28 = vld [vmem:[%s635_s2 + $0x30] sm:$0xff]  ;;  %v52_v29 = vld [vmem:[%s635_s2 + $0x38] sm:$0xff]  ;;  %v30_v33 = vld [vmem:[%s634_s1 + $0x48] sm:$0xff] }
   0xb   :  { %v150_v26 = vsel %vm74_vm0, %v63_v22, 0  ;;  %v64_v30 = vpack.c.bf16 %v52_v29, %v51_v28  ;;  %v41_v35 = vpack.c.bf16 %v30_v33, %v29_v32  ;;  %v53_v36 = vld [vmem:[%s635_s2 + $0x40] sm:$0xff]  ;;  %v54_v37 = vld [vmem:[%s635_s2 + $0x48] sm:$0xff]  ;;  %v31_v40 = vld [vmem:[%s634_s1 + $0x50] sm:$0xff] }
   0xc   :  { %v88_v31 = vsel %vm74_vm0, %v40_v27, 0  ;;  %v65_v38 = vpack.c.bf16 %v54_v37, %v53_v36  ;;  %v32_v41 = vld [vmem:[%s634_s1 + $0x58] sm:$0xff]  ;;  %v55_v44 = vld [vmem:[%s635_s2 + $0x50] sm:$0xff]  ;;  %v33_v48 = vld [vmem:[%s634_s1 + $0x60] sm:$0xff] }
   0xd   :  { %353 = vmatpush3.bf16.xpose.msra.mxu0 %v82_v15  ;;  %v153_v34 = vsel %vm74_vm0, %v64_v30, 0  ;;  %v91_v39 = vsel %vm74_vm0, %v41_v35, 0  ;;  %v42_v43 = vpack.c.bf16 %v32_v41, %v31_v40  ;;  %v56_v45 = vld [vmem:[%s635_s2 + $0x58] sm:$0xff]  ;;  %v34_v49 = vld [vmem:[%s634_s1 + $0x68] sm:$0xff]  ;;  %v57_v52 = vld [vmem:[%s635_s2 + $0x60] sm:$0xff] }
   0xe   :  { %354 = vmatprep.subr.bf16.mxu0 %v436_v2  ;;  %373 = vmatpush3.bf16.xpose.msra.mxu1 %v147_v18  ;;  %v156_v42 = vsel %vm74_vm0, %v65_v38, 0  ;;  %v66_v46 = vpack.c.bf16 %v56_v45, %v55_v44  ;;  %v43_v51 = vpack.c.bf16 %v34_v49, %v33_v48  ;;  %v58_v53 = vld [vmem:[%s635_s2 + $0x68] sm:$0xff]  ;;  %v35_v56 = vld [vmem:[%s634_s1 + $0x70] sm:$0xff]  ;;  %v36_v57 = vld [vmem:[%s634_s1 + $0x78] sm:$0xff] }
   0xf   :  { %374 = vmatprep.subr.bf16.mxu1 %v436_v2  ;;  %v94_v47 = vsel %vm74_vm0, %v42_v43, 0  ;;  %v67_v54 = vpack.c.bf16 %v58_v53, %v57_v52  ;;  %v44_v59 = vpack.c.bf16 %v36_v57, %v35_v56  ;;  %v59_v60 = vld [vmem:[%s635_s2 + $0x70] sm:$0xff]  ;;  %v60_v61 = vld [vmem:[%s635_s2 + $0x78] sm:$0xff]  ;;  %v403_v1 = vld [vmem:[%s633_s0] sm:$0xff]  }
  0x10   :  { %v159_v50 = vsel %vm74_vm0, %v66_v46, 0  ;;  %v97_v55 = vsel %vm74_vm0, %v43_v51, 0  ;;  %v68_v62 = vpack.c.bf16 %v60_v61, %v59_v60  ;;  %v225_v3 = vld [vmem:[%s636_s3] sm:$0xff]  ;;  %v226_v4 = vld [vmem:[%s636_s3 + $0x8] sm:$0xff]  ;;  %v227_v6 = vld [vmem:[%s636_s3 + $0x10] sm:$0xff] }
  0x11   :  { %v162_v58 = vsel %vm74_vm0, %v67_v54, 0  ;;  %v100_v63 = vsel %vm74_vm0, %v44_v59, 0  ;;  %v229_v5 = vpack.c.bf16 %v226_v4, %v225_v3  ;;  %v228_v7 = vld [vmem:[%s636_s3 + $0x18] sm:$0xff]  ;;  %s438_s3 = smov [#allocation3]  }
  0x12   :  { %v165_v0 = vsel %vm74_vm0, %v68_v62, 0  ;;  %v230_v8 = vpack.c.bf16 %v228_v7, %v227_v6  ;;  %s309_s8 = sshll.u32 %s438_s3, 4  ;;  %s310_s8 = int_to_ptr.vmem [resolvable:$true] %s309_s8 }
  0x13   :  { %s412_s9 = scalar_lea.vmem %s310_s8, 128  ;;  %p417_p1 = scmp.lt.s32.totalorder %s310_s8, %s310_s8 }
  0x14   :  { %p413_p0 = scmp.ne.s32.totalorder %s310_s8, %s412_s9  ;;  %p418_p2 = scmp.lt.s32.totalorder %s412_s9, %s412_s9 }
  0x15   :  { %355 = vmatpush3.bf16.xpose.msra.mxu0 %v85_v23 }
  0x16   :  { %356 = vmatprep.subr.bf16.mxu0 %v436_v2  ;;  %375 = vmatpush3.bf16.xpose.msra.mxu1 %v150_v26  ;;  %p419_p3 = por %p418_p2, %p417_p1 }
  0x17   :  { %376 = vmatprep.subr.bf16.mxu1 %v436_v2 }
  0x18   :  { %p420_p4 = pnand %p419_p3, %p413_p0 }
  0x1d   :  { %357 = vmatpush3.bf16.xpose.msra.mxu0 %v88_v31 }
  0x1e   :  { %358 = vmatprep.subr.bf16.mxu0 %v436_v2  ;;  %377 = vmatpush3.bf16.xpose.msra.mxu1 %v153_v34 }
  0x1f   :  { %378 = vmatprep.subr.bf16.mxu1 %v436_v2 }
  0x25   :  { %359 = vmatpush3.bf16.xpose.msra.mxu0 %v91_v39 }
  0x26   :  { %360 = vmatprep.subr.bf16.mxu0 %v436_v2  ;;  %379 = vmatpush3.bf16.xpose.msra.mxu1 %v156_v42 }
  0x27   :  { %380 = vmatprep.subr.bf16.mxu1 %v436_v2 }
  0x2d   :  { %361 = vmatpush3.bf16.xpose.msra.mxu0 %v94_v47 }
  0x2e   :  { %362 = vmatprep.subr.bf16.mxu0 %v436_v2  ;;  %381 = vmatpush3.bf16.xpose.msra.mxu1 %v159_v50 }
  0x2f   :  { %382 = vmatprep.subr.bf16.mxu1 %v436_v2 }
  0x35   :  { %363 = vmatpush3.bf16.xpose.msra.mxu0 %v97_v55 }
  0x36   :  { %364 = vmatprep.subr.bf16.mxu0 %v436_v2  ;;  %383 = vmatpush3.bf16.xpose.msra.mxu1 %v162_v58 }
  0x37   :  { %384 = vmatprep.subr.bf16.mxu1 %v436_v2 }
  0x3d   :  { %365 = vmatpush3.bf16.xpose.msra.mxu0 %v100_v63 }
  0x3e   :  { %390 = vmatprep.subr.bf16.mxu0 %v436_v2  ;;  %385 = vmatpush3.bf16.xpose.msra.mxu1 %v165_v0 }
  0x44   :  { %367 = vmatmul.mubr.msk.bf16.vlgmr.msra.gmra.mrb[0].mxu0 %vm74_vm0, %v403_v1 }
  0x45   :  { %394 = vmatprep.mubr.msk.bf16.mxu0 %vm437_vm1, %v436_v2  ;;  %387 = vmatmul.mubr.msk.bf16.vlgmr.msra.gmra.mrb[0].mxu1 %vm74_vm0, %v403_v1 }
  0x46   :  { %391 = vmatpush3.bf16.xpose.msra.mxu0 %v229_v5 }
  0x47   :  { %392 = vmatprep.subr.bf16.mxu0 %v436_v2 }
  0x4e   :  { %393 = vmatpush3.bf16.xpose.msra.mxu0 %v230_v8 }
 0x117   :  { %v136_v9 = vpop.f32.mrb[0].mxu0 }
 0x118   :  { %v323_v10 = vmul.f32 -1.442695, %v136_v9  ;;  %v368_v11 = vpop.f32.mrb[1].mxu0  ;;  %v201_v15 = vpop.f32.mrb[0].mxu1 }
 0x119   :  { %v139_v12 = vpop.f32.mrb[2].mxu0  ;;  %v388_v16 = vpop.f32.mrb[1].mxu1 }
 0x11a   :  { %404 = vpow2.f32 %v323_v10  ;;  %v324_v13 = vmul.f32 -1.442695, %v139_v12  ;;  %v369_v14 = vpop.f32.mrb[3].mxu0  ;;  %v204_v2 = vpop.f32.mrb[2].mxu1 }
 0x11b   :  { %v389_v17 = vpop.f32.mrb[3].mxu1 }
 0x11c   :  { %406 = vpow2.f32 %v324_v13 }
 0x124   :  { %v405_v18 = vpop.eup %404 }
 0x125   :  { %v214_v19 = vadd.f32 1.0, %v405_v18 }
 0x126   :  { %v407_v20 = vpop.eup %406 }
 0x127   :  { %408 = vrcp.f32 %v214_v19  ;;  %v215_v21 = vadd.f32 1.0, %v407_v20 }
 0x129   :  { %410 = vrcp.f32 %v215_v21 }
 0x131   :  { %v409_v22 = vpop.eup %408 }
 0x132   :  { %v220_v23 = vmul.f32 %v409_v22, %v136_v9 }
 0x133   :  { %v411_v24 = vpop.eup %410 }
 0x134   :  { %v221_v25 = vmul.f32 %v411_v24, %v139_v12  ;;  %v222_v26 = vmul.f32 %v220_v23, %v201_v15 }
 0x136   :  { %v223_v27 = vmul.f32 %v221_v25, %v204_v2 }
 0x138   :  { %v224_v28 = vpack.c.bf16 %v223_v27, %v222_v26 }
 0x13a   :  { %395 = vmatmul.mubr.bf16.vlgmr.msra.gmra.mrb[4].mxu0 %v224_v28 }
 0x20d   :  { %v265_v29 = vpop.f32.mrb[4].mxu0 }
 0x20e   :  { %276 = vst.msk [vmem:[#allocation2] sm:$0xff] %vm74_vm0, %v265_v29  ;;  %v396_v30 = vpop.f32.mrb[5].mxu0 }
 0x20f   :  { %v268_v31 = vpop.f32.mrb[6].mxu0 }
 0x210   :  { %277 = vst.msk [vmem:[#allocation2 + $0x8] sm:$0xff] %vm74_vm0, %v268_v31  ;;  %v397_v32 = vpop.f32.mrb[7].mxu0 }
 0x215   :  { %v291_v33 = vld [vmem:[#allocation2] sm:$0xff] }
 0x216   :  { %v327_v34 = vpack.c.bf16 %v291_v33, %v291_v33 }
 0x217   :  { %v292_v35 = vld [vmem:[#allocation2 + $0x8] sm:$0xff] }
 0x218   :  { %v328_v36 = vpack.c.bf16 %v292_v35, %v292_v35  ;;  %302 = vst.msk [vmem:[#allocation3] sm:$0xf] %vm301_vm2, %v327_v34 }
 0x21a   :  { %303 = vst.msk [vmem:[#allocation3 + $0x4] sm:$0xf] %vm301_vm2, %v328_v36 }
 0x21b   :  { %423 = shalt.err (!%p420_p4)
}
 0x21c   :  { %s424_s12 = scalar_lea.hbm %s637_s4, 128 }
 0x21d   :  { %p425_p5 = scmp.ne.s32.totalorder %s637_s4, %s424_s12  ;;  %p428_p6 = scmp.lt.u32.totalorder %s424_s12, %s637_s4 }
 0x21f   :  { %p430_p7 = pnand %p428_p6, %p425_p5 }
 0x221   :  { %433 = shalt.err (!%p430_p7)
}
 0x222   :  { %s439_s17 = smov 64   ;;  %s440_s18 = smov 4  }
 0x223   :  { %315 = dma.vmem_to_hbm [thread:$0]  %s310_s8, 128, %s637_s4, [#allocation4], %s439_s17, %s439_s17, %s440_s18  }
 0x224   :  { %434 = dma.done.wait [#allocation4], 128  }
 0x225   :  { %435 = vsyncadd [#allocation4], 4294967168 }
 0x226   :  { %319 = vsyncpa [#allocation4], 1 }

</bundles_post_ra>
